<compile_context>
chip_gen: v5e
topology: v5e:2x2
jax: 0.10.0
libtpu: 0.0.40
codegen_flags: <defaults>
</compile_context>

<pallas_src>
import jax
import jax.numpy as jnp
from jax.experimental import pallas as pl
from jax.experimental.pallas import tpu as pltpu

IN_FEATURES = 2
HIDDEN = 100
CLASSES = 4
PAD = 128          # lane-aligned width for hidden / class dims
TILE_M = 2048      # rows per grid step; h1/h2 temporaries ~1 MiB each at this
                   # size, well inside the scoped-VMEM default on v5e/v6e/v7x


def _bnn_kernel(x_ref, w1_ref, b1_ref, w2_ref, b2_ref, w3_ref, b3_ref, out_ref):
    x = x_ref[...]                                   # (TM, 2)   f32
    w1 = w1_ref[...]                                 # (2, 128)  f32

    # ---- layer 1: Linear(2, 100) + ReLU  (K=2 -> VPU broadcast FMAs, not MXU)
    h1 = x[:, 0:1] * w1[0:1, :] + x[:, 1:2] * w1[1:2, :] + b1_ref[...]
    h1 = jnp.maximum(h1, 0.0)                        # (TM, 128) f32; pad lanes = 0

    # ---- layer 2: Linear(100, 100) + ReLU  (bf16 MXU, f32 accumulation)
    h2 = jnp.dot(h1.astype(jnp.bfloat16), w2_ref[...],
                 preferred_element_type=jnp.float32) + b2_ref[...]
    h2 = jnp.maximum(h2, 0.0)                        # (TM, 128) f32; pad lanes = 0

    # ---- layer 3: Linear(100, 4)  (padded to 128 class lanes; pad cols of w3/b3 are 0)
    logits = jnp.dot(h2.astype(jnp.bfloat16), w3_ref[...],
                     preferred_element_type=jnp.float32) + b3_ref[...]
    logits = logits[:, :CLASSES]                     # drop padded class lanes

    # ---- softmax over the class dim (max-shifted; EUP reciprocal)
    m = jnp.max(logits, axis=-1, keepdims=True)
    e = jnp.exp(logits - m)
    inv = pl.reciprocal(jnp.sum(e, axis=-1, keepdims=True), approx=True)
    out_ref[...] = e * inv


def bayesian_network_forward(x, packed_params, tile_m=TILE_M):
    """x: (N, 2) float32.  packed_params from pack_params().  Returns (N, 4) probs."""
    w1, b1, w2, b2, w3, b3 = packed_params
    n = x.shape[0]

    # Pad the batch to a sublane-aligned multiple of the tile size.
    n8 = max(8, pl.cdiv(n, 8) * 8)
    tm = min(tile_m, n8)
    n_pad = pl.cdiv(n8, tm) * tm
    if n_pad != n:
        x = jnp.pad(x, ((0, n_pad - n), (0, 0)))

    const = lambda i: (0, 0)
    out = pl.pallas_call(
        _bnn_kernel,
        out_shape=jax.ShapeDtypeStruct((n_pad, CLASSES), jnp.float32),
        grid=(n_pad // tm,),
        in_specs=[
            pl.BlockSpec((tm, IN_FEATURES), lambda i: (i, 0)),   # x: streamed
            pl.BlockSpec(w1.shape, const),                        # weights/biases:
            pl.BlockSpec(b1.shape, const),                        #   resident in VMEM
            pl.BlockSpec(w2.shape, const),
            pl.BlockSpec(b2.shape, const),
            pl.BlockSpec(w3.shape, const),
            pl.BlockSpec(b3.shape, const),
        ],
        out_specs=pl.BlockSpec((tm, CLASSES), lambda i: (i, 0)),
        compiler_params=pltpu.CompilerParams(
            dimension_semantics=("parallel",)),                   # v7x: 2 TCs share grid
    )(x, w1, b1, w2, b2, w3, b3)
    return out[:n]


def init_params(key):
    """Logical f32 parameters matching BayesianLinear's mu init: U(-0.2, 0.2).

    PyTorch stores weight as (out, in); we store the transpose (in, out) so the
    kernel computes x @ W directly (same math as F.linear(x, W, b)).
    """
    ks = jax.random.split(key, 6)
    u = lambda k, shape: jax.random.uniform(k, shape, jnp.float32,
                                            minval=-0.2, maxval=0.2)
    w1 = u(ks[0], (IN_FEATURES, HIDDEN))
    b1 = u(ks[1], (HIDDEN,))
    w2 = u(ks[2], (HIDDEN, HIDDEN))
    b2 = u(ks[3], (HIDDEN,))
    w3 = u(ks[4], (HIDDEN, CLASSES))
    b3 = u(ks[5], (CLASSES,))
    return (w1, b1, w2, b2, w3, b3)


def pack_params(params):
    """Zero-pad feature dims to 128 lanes; cast MXU weights to bf16."""
    w1, b1, w2, b2, w3, b3 = params
    padc = lambda a, cols: jnp.pad(a, ((0, 0), (0, cols - a.shape[1])))
    w1p = padc(w1, PAD)                                               # (2, 128)   f32
    b1p = padc(b1[None, :], PAD)                                      # (1, 128)   f32
    w2p = jnp.pad(w2, ((0, PAD - HIDDEN), (0, PAD - HIDDEN))
                  ).astype(jnp.bfloat16)                              # (128, 128) bf16
    b2p = padc(b2[None, :], PAD)                                      # (1, 128)   f32
    w3p = jnp.pad(w3, ((0, PAD - HIDDEN), (0, PAD - CLASSES))
                  ).astype(jnp.bfloat16)                              # (128, 128) bf16
    b3p = padc(b3[None, :], PAD)                                      # (1, 128)   f32
    return (w1p, b1p, w2p, b2p, w3p, b3p)


# TODO(synk): sample_elbo / log_prior / log_variational_posterior (the KL terms of
# Bayes-by-Backprop training) and the sample=True weight-sampling path are not
# part of the inference hot path and are not implemented here.

if __name__ == "__main__":
    key = jax.random.PRNGKey(0)
    pkey, xkey = jax.random.split(key)
    logical_params = init_params(pkey)
    kernel_params = pack_params(logical_params)

    batch = 10  # BATCH_SIZE in the original script
    x = jax.random.uniform(xkey, (batch, IN_FEATURES), jnp.float32)  # MinMax-scaled inputs in [0, 1)

    probs = bayesian_network_forward(x, kernel_params)
    jax.block_until_ready(probs)

    assert probs.shape == (batch, CLASSES)
    # softmax rows sum to ~1 (approx reciprocal -> loose tolerance)
    assert jnp.allclose(jnp.sum(probs, axis=1), 1.0, atol=1e-2)

    # cross-check against a plain-JAX f32 reference (kernel uses bf16 MXU inputs)
    w1, b1, w2, b2, w3, b3 = logical_params
    h1 = jnp.maximum(x @ w1 + b1, 0.0)
    h2 = jnp.maximum(h1 @ w2 + b2, 0.0)
    ref = jax.nn.softmax(h2 @ w3 + b3, axis=1)
    assert jnp.allclose(probs, ref, atol=2e-2), float(jnp.max(jnp.abs(probs - ref)))

    print("KERNEL_OK")
</pallas_src>

<mosaic_0001>
module attributes {stable_mosaic.version = 11 : i64} {
  func.func @_bnn_kernel(%arg0: i32, %arg1: memref<16x2xf32, #tpu.memory_space<vmem>>, %arg2: memref<2x128xf32, #tpu.memory_space<vmem>>, %arg3: memref<1x128xf32, #tpu.memory_space<vmem>>, %arg4: memref<128x128xbf16, #tpu.memory_space<vmem>>, %arg5: memref<1x128xf32, #tpu.memory_space<vmem>>, %arg6: memref<128x128xbf16, #tpu.memory_space<vmem>>, %arg7: memref<1x128xf32, #tpu.memory_space<vmem>>, %arg8: memref<16x4xf32, #tpu.memory_space<vmem>>) attributes {dimension_semantics = [#tpu.dimension_semantics<parallel>], iteration_bounds = array<i64: 1>, scalar_prefetch = 0 : i64, scratch_operands = 0 : i64, tpu.core_type = #tpu.core_type<tc>, window_params = [{transform_indices = @transform_0, window_bounds = array<i64: 16, 2>}, {pipeline_mode = #tpu.pipeline_mode<synchronous>, transform_indices = @transform_1, window_bounds = array<i64: 2, 128>}, {pipeline_mode = #tpu.pipeline_mode<synchronous>, transform_indices = @transform_2, window_bounds = array<i64: 1, 128>}, {pipeline_mode = #tpu.pipeline_mode<synchronous>, transform_indices = @transform_3, window_bounds = array<i64: 128, 128>}, {pipeline_mode = #tpu.pipeline_mode<synchronous>, transform_indices = @transform_4, window_bounds = array<i64: 1, 128>}, {pipeline_mode = #tpu.pipeline_mode<synchronous>, transform_indices = @transform_5, window_bounds = array<i64: 128, 128>}, {pipeline_mode = #tpu.pipeline_mode<synchronous>, transform_indices = @transform_6, window_bounds = array<i64: 1, 128>}, {transform_indices = @transform_7, window_bounds = array<i64: 16, 4>}]} {
    %c0 = arith.constant 0 : index
    %c0_0 = arith.constant 0 : index
    %0 = vector.load %arg1[%c0, %c0_0] : memref<16x2xf32, #tpu.memory_space<vmem>>, vector<16x2xf32>
    %c0_1 = arith.constant 0 : index
    %c0_2 = arith.constant 0 : index
    %1 = vector.load %arg2[%c0_1, %c0_2] : memref<2x128xf32, #tpu.memory_space<vmem>>, vector<2x128xf32>
    %2 = vector.extract_strided_slice %0 {offsets = [0, 0], sizes = [16, 1], strides = [1, 1]} : vector<16x2xf32> to vector<16x1xf32>
    %3 = vector.extract_strided_slice %1 {offsets = [0, 0], sizes = [1, 128], strides = [1, 1]} : vector<2x128xf32> to vector<1x128xf32>
    %4 = vector.broadcast %2 : vector<16x1xf32> to vector<16x128xf32>
    %5 = vector.broadcast %3 : vector<1x128xf32> to vector<16x128xf32>
    %6 = arith.mulf %4, %5 : vector<16x128xf32>
    %7 = vector.extract_strided_slice %0 {offsets = [0, 1], sizes = [16, 1], strides = [1, 1]} : vector<16x2xf32> to vector<16x1xf32>
    %8 = vector.extract_strided_slice %1 {offsets = [1, 0], sizes = [1, 128], strides = [1, 1]} : vector<2x128xf32> to vector<1x128xf32>
    %9 = vector.broadcast %7 : vector<16x1xf32> to vector<16x128xf32>
    %10 = vector.broadcast %8 : vector<1x128xf32> to vector<16x128xf32>
    %11 = arith.mulf %9, %10 : vector<16x128xf32>
    %12 = arith.addf %6, %11 : vector<16x128xf32>
    %c0_3 = arith.constant 0 : index
    %c0_4 = arith.constant 0 : index
    %13 = vector.load %arg3[%c0_3, %c0_4] : memref<1x128xf32, #tpu.memory_space<vmem>>, vector<1x128xf32>
    %14 = vector.broadcast %13 : vector<1x128xf32> to vector<16x128xf32>
    %15 = arith.addf %12, %14 : vector<16x128xf32>
    %cst = arith.constant 0.000000e+00 : f32
    %16 = vector.broadcast %cst : f32 to vector<16x128xf32>
    %17 = arith.maximumf %15, %16 : vector<16x128xf32>
    %18 = arith.truncf %17 : vector<16x128xf32> to vector<16x128xbf16>
    %c0_5 = arith.constant 0 : index
    %c0_6 = arith.constant 0 : index
    %19 = vector.load %arg4[%c0_5, %c0_6] : memref<128x128xbf16, #tpu.memory_space<vmem>>, vector<128x128xbf16>
    %cst_7 = arith.constant dense<0.000000e+00> : vector<16x128xf32>
    %20 = tpu.matmul %18, %19, %cst_7 {dimension_numbers = #tpu.dot_dimension_numbers<[1], [0], [0], [1], [0, 0, 1, 1], [], []>} : vector<16x128xbf16>, vector<128x128xbf16>, vector<16x128xf32> -> vector<16x128xf32>
    %c0_8 = arith.constant 0 : index
    %c0_9 = arith.constant 0 : index
    %21 = vector.load %arg5[%c0_8, %c0_9] : memref<1x128xf32, #tpu.memory_space<vmem>>, vector<1x128xf32>
    %22 = vector.broadcast %21 : vector<1x128xf32> to vector<16x128xf32>
    %23 = arith.addf %20, %22 : vector<16x128xf32>
    %cst_10 = arith.constant 0.000000e+00 : f32
    %24 = vector.broadcast %cst_10 : f32 to vector<16x128xf32>
    %25 = arith.maximumf %23, %24 : vector<16x128xf32>
    %26 = arith.truncf %25 : vector<16x128xf32> to vector<16x128xbf16>
    %c0_11 = arith.constant 0 : index
    %c0_12 = arith.constant 0 : index
    %27 = vector.load %arg6[%c0_11, %c0_12] : memref<128x128xbf16, #tpu.memory_space<vmem>>, vector<128x128xbf16>
    %cst_13 = arith.constant dense<0.000000e+00> : vector<16x128xf32>
    %28 = tpu.matmul %26, %27, %cst_13 {dimension_numbers = #tpu.dot_dimension_numbers<[1], [0], [0], [1], [0, 0, 1, 1], [], []>} : vector<16x128xbf16>, vector<128x128xbf16>, vector<16x128xf32> -> vector<16x128xf32>
    %c0_14 = arith.constant 0 : index
    %c0_15 = arith.constant 0 : index
    %29 = vector.load %arg7[%c0_14, %c0_15] : memref<1x128xf32, #tpu.memory_space<vmem>>, vector<1x128xf32>
    %30 = vector.broadcast %29 : vector<1x128xf32> to vector<16x128xf32>
    %31 = arith.addf %28, %30 : vector<16x128xf32>
    %32 = vector.extract_strided_slice %31 {offsets = [0, 0], sizes = [16, 4], strides = [1, 1]} : vector<16x128xf32> to vector<16x4xf32>
    %cst_16 = arith.constant dense<0xFF800000> : vector<16xf32>
    %33 = vector.multi_reduction <maximumf>, %32, %cst_16 [1] : vector<16x4xf32> to vector<16xf32>
    %34 = vector.shape_cast %33 : vector<16xf32> to vector<16x1xf32>
    %35 = vector.broadcast %34 : vector<16x1xf32> to vector<16x4xf32>
    %36 = arith.subf %32, %35 : vector<16x4xf32>
    %37 = math.exp %36 : vector<16x4xf32>
    %cst_17 = arith.constant dense<0.000000e+00> : vector<16xf32>
    %38 = vector.multi_reduction <add>, %37, %cst_17 [1] : vector<16x4xf32> to vector<16xf32>
    %39 = vector.shape_cast %38 : vector<16xf32> to vector<16x1xf32>
    %40 = tpu.reciprocal %39 {approx = true} : vector<16x1xf32> -> vector<16x1xf32>
    %41 = vector.broadcast %40 : vector<16x1xf32> to vector<16x4xf32>
    %42 = arith.mulf %37, %41 : vector<16x4xf32>
    %c0_18 = arith.constant 0 : index
    %c0_19 = arith.constant 0 : index
    %43 = vector.load %arg8[%c0_18, %c0_19] : memref<16x4xf32, #tpu.memory_space<vmem>>, vector<16x4xf32>
    tpu.vector_store %arg8[%c0_18, %c0_19], %42 {strides = array<i32>} : memref<16x4xf32, #tpu.memory_space<vmem>>, vector<16x4xf32>,
    return
  }
  func.func @transform_0(%arg0: i32) -> (i32, i32) {
    %c0_i32 = arith.constant 0 : i32
    %c0_i32_0 = arith.constant 0 : i32
    return %arg0, %c0_i32 : i32, i32
  }
  func.func @transform_1(%arg0: i32) -> (i32, i32) {
    %c0_i32 = arith.constant 0 : i32
    %c0_i32_0 = arith.constant 0 : i32
    %c0_i32_1 = arith.constant 0 : i32
    return %c0_i32, %c0_i32_0 : i32, i32
  }
  func.func @transform_2(%arg0: i32) -> (i32, i32) {
    %c0_i32 = arith.constant 0 : i32
    %c0_i32_0 = arith.constant 0 : i32
    %c0_i32_1 = arith.constant 0 : i32
    return %c0_i32, %c0_i32_0 : i32, i32
  }
  func.func @transform_3(%arg0: i32) -> (i32, i32) {
    %c0_i32 = arith.constant 0 : i32
    %c0_i32_0 = arith.constant 0 : i32
    %c0_i32_1 = arith.constant 0 : i32
    return %c0_i32, %c0_i32_0 : i32, i32
  }
  func.func @transform_4(%arg0: i32) -> (i32, i32) {
    %c0_i32 = arith.constant 0 : i32
    %c0_i32_0 = arith.constant 0 : i32
    %c0_i32_1 = arith.constant 0 : i32
    return %c0_i32, %c0_i32_0 : i32, i32
  }
  func.func @transform_5(%arg0: i32) -> (i32, i32) {
    %c0_i32 = arith.constant 0 : i32
    %c0_i32_0 = arith.constant 0 : i32
    %c0_i32_1 = arith.constant 0 : i32
    return %c0_i32, %c0_i32_0 : i32, i32
  }
  func.func @transform_6(%arg0: i32) -> (i32, i32) {
    %c0_i32 = arith.constant 0 : i32
    %c0_i32_0 = arith.constant 0 : i32
    %c0_i32_1 = arith.constant 0 : i32
    return %c0_i32, %c0_i32_0 : i32, i32
  }
  func.func @transform_7(%arg0: i32) -> (i32, i32) {
    %c0_i32 = arith.constant 0 : i32
    %c0_i32_0 = arith.constant 0 : i32
    return %arg0, %c0_i32 : i32, i32
  }
}

</mosaic_0001>

<bundles_post_ra>
// kernel: tpu_custom_call.1
= control target key start
LH: loop header
LB: loop body
LE: loop exit
PB: predicated region body
PF: predicated region fallthrough
CT: control target
= control target key end

     0   :  { %12 = vsyncpa [#allocation3], 0  ;;  %s528_s0 = inlined_call_operand.vmem [shape: f32[16,2], index: 0, kind: input, shape index: {}]   ;;  %s529_s1 = inlined_call_operand.vmem [shape: f32[2,128], index: 1, kind: input, shape index: {}]   ;;  %s530_s2 = inlined_call_operand.vmem [shape: f32[1,128], index: 2, kind: input, shape index: {}]   ;;  %s531_s3 = inlined_call_operand.hbm [shape: bf16[128,128], index: 3, kind: input, shape index: {}]   ;;  %s532_s4 = inlined_call_operand.vmem [shape: f32[1,128], index: 4, kind: input, shape index: {}]   ;;  %s533_s5 = inlined_call_operand.hbm [shape: bf16[128,128], index: 5, kind: input, shape index: {}]   ;;  %s534_s6 = inlined_call_operand.vmem [shape: f32[1,128], index: 6, kind: input, shape index: {}]   ;;  %s535_s7 = inlined_call_operand.vmem [shape: f32[16,4], index: 7, kind: output, shape index: {}]  }
   0x1   :  { %s24_s26 = sshll.u32 %s531_s3, 4  ;;  %s25_s26 = int_to_ptr.hbm [resolvable:$true] %s24_s26 }
   0x2   :  { %13 = vsyncpa [#allocation5], 0  ;;  %s446_s27 = smov [#allocation2]   ;;  %s39_s8 = sshll.u32 %s533_s5, 4  ;;  %s40_s8 = int_to_ptr.hbm [resolvable:$true] %s39_s8 }
   0x3   :  { %s26_s28 = sshll.u32 %s446_s27, 4  ;;  %s447_s9 = smov 64   ;;  %s27_s28 = int_to_ptr.vmem [resolvable:$true] %s26_s28 }
   0x4   :  { %s448_s10 = smov 4   ;;  %s449_s11 = smov [#allocation4]  }
   0x5   :  { %32 = dma.hbm_to_vmem [thread:$0]  %s25_s26, 1024, %s27_s28, [#allocation3], %s447_s9, %s447_s9, %s448_s10  }
   0x6   :  { %s41_s12 = sshll.u32 %s449_s11, 4  ;;  %s42_s12 = int_to_ptr.vmem [resolvable:$true] %s41_s12 }
   0x7   :  { %47 = dma.hbm_to_vmem [thread:$0]  %s40_s8, 1024, %s42_s12, [#allocation5], %s447_s9, %s447_s9, %s448_s10  }
   0x8   :  { %442 = dma.done.wait [#allocation3], 1024  }
   0x9   :  { %443 = vsyncadd [#allocation3], 4294966272 }
   0xa   :  { %444 = dma.done.wait [#allocation5], 1024  }
   0xb   :  { %445 = vsyncadd [#allocation5], 4294966272  ;;  %v450_v0 = vmov 1   ;;  %v451_v1 = vmov 0   ;;  %v58_v2 = vld [vmem:[%s528_s0] sm:$0xff]  ;;  %v365_v3 = vld [vmem:[#allocation2 + $0x38] sm:$0xff] }
   0xc   :  { %381 = vset.pattern.permute.xlu1 %v450_v0  ;;  %380 = vset.pattern.permute.xlu0 %v451_v1  ;;  %v364_v4 = vld [vmem:[#allocation2 + $0x30] sm:$0xff]  ;;  %v59_v5 = vld [vmem:[%s528_s0 + $0x8] sm:$0xff]  ;;  %v362_v7 = vld [vmem:[#allocation2 + $0x20] sm:$0xff]  ;;  %vm263_vm0 = vcmask 31744  }
   0xd   :  { %75 = vperm.xlu1 %381, %v58_v2   ;;  %63 = vperm.xlu0 %380, %v58_v2   ;;  %v363_v6 = vld [vmem:[#allocation2 + $0x28] sm:$0xff]  ;;  %v361_v8 = vld [vmem:[#allocation2 + $0x18] sm:$0xff]  ;;  %v360_v9 = vld [vmem:[#allocation2 + $0x10] sm:$0xff] }
   0xe   :  { %164 = vmatpush.bf16.msra.mxu0 %v365_v3  ;;  %v359_v10 = vld [vmem:[#allocation2 + $0x8] sm:$0xff]  ;;  %v358_v11 = vld [vmem:[#allocation2] sm:$0xff]  ;;  %v373_v12 = vld [vmem:[#allocation4 + $0x38] sm:$0xff] }
   0xf   :  { %249 = vmatpush.bf16.msra.mxu1 %v373_v12  ;;  %v372_v13 = vld [vmem:[#allocation4 + $0x30] sm:$0xff]  ;;  %v371_v14 = vld [vmem:[#allocation4 + $0x28] sm:$0xff]  ;;  %v60_v15 = vld [vmem:[%s529_s1] sm:$0x3] }
  0x10   :  { %v370_v16 = vld [vmem:[#allocation4 + $0x20] sm:$0xff]  ;;  %v82_v17 = vperm.slane %v60_v15, 1  ;;  %v71_v18 = vperm.slane %v60_v15, 0  ;;  %v369_v35 = vld [vmem:[#allocation4 + $0x18] sm:$0xff]  ;;  %v368_v36 = vld [vmem:[#allocation4 + $0x10] sm:$0xff] }
  0x11   :  { %v383_v24 = vld [vmem:[%s530_s2] ss:$0 sm:$0xff]  ;;  %v367_v37 = vld [vmem:[#allocation4 + $0x8] sm:$0xff] }
  0x12   :  { %165 = vmatpush.bf16.msra.mxu0 %v364_v4  ;;  %v366_v38 = vld [vmem:[#allocation4] sm:$0xff] }
  0x13   :  { %250 = vmatpush.bf16.msra.mxu1 %v372_v13  ;;  %v384_v40 = vld [vmem:[%s532_s4] ss:$0 sm:$0xff] }
  0x14   :  { %v385_v47 = vld [vmem:[%s534_s6] ss:$0 sm:$0xff] }
  0x15   :  { %79 = vperm.xlu1 %381, %v59_v5   ;;  %68 = vperm.xlu0 %380, %v59_v5  }
  0x16   :  { %166 = vmatpush.bf16.msra.mxu0 %v363_v6 }
  0x17   :  { %251 = vmatpush.bf16.msra.mxu1 %v371_v14 }
  0x1a   :  { %167 = vmatpush.bf16.msra.mxu0 %v362_v7 }
  0x1b   :  { %252 = vmatpush.bf16.msra.mxu1 %v370_v16 }
  0x1d   :  { %382 = vset.pattern.permute.xlu0 %v450_v0 }
  0x1e   :  { %168 = vmatpush.bf16.msra.mxu0 %v361_v8 }
  0x1f   :  { %253 = vmatpush.bf16.msra.mxu1 %v369_v35 }
  0x22   :  { %169 = vmatpush.bf16.msra.mxu0 %v360_v9 }
  0x23   :  { %254 = vmatpush.bf16.msra.mxu1 %v368_v36 }
  0x26   :  { %170 = vmatpush.bf16.msra.mxu0 %v359_v10 }
  0x27   :  { %255 = vmatpush.bf16.msra.mxu1 %v367_v37 }
  0x2a   :  { %171 = vmatpush.bf16.msra.mxu0 %v358_v11 }
  0x2b   :  { %256 = vmatpush.bf16.msra.mxu1 %v366_v38 }
  0x7f   :  { %v76_v19 = vpop.permute.xlu1 %75  ;;  %v64_v20 = vpop.permute.xlu0 %63 }
  0x80   :  { %v83_v21 = vmul.f32 %v82_v17, %v76_v19  ;;  %v72_v22 = vmul.f32 %v71_v18, %v64_v20 }
  0x82   :  { %v85_v23 = vadd.f32 %v83_v21, %v72_v22 }
  0x84   :  { %v91_v30 = vadd.f32 %v383_v24, %v85_v23 }
  0x86   :  { %v93_v32 = vmax.f32 %v91_v30, 0.0 }
  0x87   :  { %v80_v25 = vpop.permute.xlu1 %79  ;;  %v69_v26 = vpop.permute.xlu0 %68 }
  0x88   :  { %v84_v27 = vmul.f32 %v82_v17, %v80_v25  ;;  %v73_v28 = vmul.f32 %v71_v18, %v69_v26 }
  0x8a   :  { %v86_v29 = vadd.f32 %v84_v27, %v73_v28 }
  0x8c   :  { %v92_v31 = vadd.f32 %v383_v24, %v86_v29 }
  0x8e   :  { %v94_v33 = vmax.f32 %v92_v31, 0.0 }
  0x90   :  { %v95_v34 = vpack.c.bf16 %v94_v33, %v93_v32 }
  0x92   :  { %172 = vmatmul.bf16.vlgmr.msra.gmra.mxu0 %v95_v34 }
 0x10f   :  { %v173_v39 = vpop.f32.mrf.mxu0 }
 0x110   :  { %v174_v41 = vadd.f32 %v384_v40, %v173_v39 }
 0x112   :  { %v178_v44 = vmax.f32 %v174_v41, 0.0 }
 0x117   :  { %v175_v42 = vpop.f32.mrf.mxu0 }
 0x118   :  { %v176_v43 = vadd.f32 %v384_v40, %v175_v42 }
 0x11a   :  { %v179_v45 = vmax.f32 %v176_v43, 0.0 }
 0x11c   :  { %v180_v46 = vpack.c.bf16 %v179_v45, %v178_v44 }
 0x11e   :  { %257 = vmatmul.bf16.vlgmr.msra.gmra.mxu1 %v180_v46 }
 0x19b   :  { %v258_v48 = vpop.f32.mrf.mxu1 }
 0x19c   :  { %v259_v49 = vadd.f32 %v385_v47, %v258_v48 }
 0x19e   :  { %v264_v50 = vsel %vm263_vm0, %v259_v49, -inf }
 0x19f   :  { %265 = vmax.xlane.f32.xlu2 %v264_v50 }
 0x1a3   :  { %v260_v51 = vpop.f32.mrf.mxu1 }
 0x1a4   :  { %v261_v52 = vadd.f32 %v385_v47, %v260_v51 }
 0x1a6   :  { %v267_v53 = vsel %vm263_vm0, %v261_v52, -inf }
 0x1a7   :  { %268 = vmax.xlane.f32.xlu2 %v267_v53 }
 0x212   :  { %v266_v54 = vpop.xlane.xlu2 %265 }
 0x213   :  { %v270_v55 = vsub.f32 %v259_v49, %v266_v54 }
 0x215   :  { %v272_v56 = vmul.f32 1.442695, %v270_v55 }
 0x217   :  { %386 = vpow2.f32 %v272_v56 }
 0x21a   :  { %v269_v57 = vpop.xlane.xlu2 %268 }
 0x21b   :  { %v271_v58 = vsub.f32 %v261_v52, %v269_v57 }
 0x21d   :  { %v387_v59 = vpop.eup %386  ;;  %v274_v60 = vmul.f32 1.442695, %v271_v58 }
 0x21e   :  { %v276_v61 = vsel %vm263_vm0, %v387_v59, 0.0 }
 0x21f   :  { %388 = vpow2.f32 %v274_v60  ;;  %277 = vadd.xlane.f32.xlu0 %v276_v61 }
 0x225   :  { %v389_v62 = vpop.eup %388 }
 0x226   :  { %v279_v63 = vsel %vm263_vm0, %v389_v62, 0.0 }
 0x227   :  { %280 = vadd.xlane.f32.xlu1 %v279_v63 }
 0x292   :  { %v278_v0 = vpop.xlane.xlu0 %277 }
 0x293   :  { %390 = vrcp.f32 %v278_v0 }
 0x299   :  { %v391_v1 = vpop.eup %390 }
 0x29a   :  { %v284_v2 = vmul.f32 %v391_v1, %v387_v59  ;;  %v281_v3 = vpop.xlane.xlu1 %280 }
 0x29b   :  { %392 = vrcp.f32 %v281_v3 }
 0x29c   :  { %286 = vst.msk [vmem:[%s535_s7] sm:$0xff] %vm263_vm0, %v284_v2 }
 0x2a1   :  { %v393_v4 = vpop.eup %392 }
 0x2a2   :  { %v285_v5 = vmul.f32 %v393_v4, %v389_v62 }
 0x2a4   :  { %287 = vst.msk [vmem:[%s535_s7 + $0x8] sm:$0xff] %vm263_vm0, %v285_v5 }
 0x2a5   :  { %292 = vsyncpa [#allocation3], 1 }
 0x2a6   :  { %293 = vsyncpa [#allocation5], 1 }

</bundles_post_ra>
